<compile_context>
chip_gen: v6e
topology: v6e:2x2x1
jax: 0.10.0
libtpu: 0.0.40
codegen_flags: <defaults>
</compile_context>

<pallas_src>
import jax
import jax.numpy as jnp
from jax.experimental import pallas as pl
from jax.experimental.pallas import tpu as pltpu


def _round_up(x, m):
    return ((x + m - 1) // m) * m


def _device_defaults():
    """Roofline-derived per-generation tile / VMEM-limit defaults."""
    try:
        kind = jax.devices()[0].device_kind.lower()
    except Exception:
        kind = ""
    if "v5 lite" in kind or "v5e" in kind:
        # ridge ~197TF / 0.82TB/s ~= 240 flops/byte; 128 MiB VMEM (16 MiB default scoped).
        return dict(tile_m=256, tile_i=2048, vmem_limit_bytes=96 * 1024 * 1024)
    if "v7" in kind or "tpu7" in kind:
        # ridge ~996TF / 3.2TB/s ~= 310 flops/byte; only 64 MiB VMEM -> shrink tI, cap limit.
        return dict(tile_m=512, tile_i=512, vmem_limit_bytes=56 * 1024 * 1024)
    if "v6" in kind:
        # ridge ~918TF / 1.35TB/s ~= 680 flops/byte; 128 MiB VMEM.
        return dict(tile_m=768, tile_i=1024, vmem_limit_bytes=104 * 1024 * 1024)
    return dict(tile_m=512, tile_i=1024, vmem_limit_bytes=64 * 1024 * 1024)


# ----------------------------- Pallas kernel ---------------------------------
def _grouped_mlp_kernel(te_ref,                         # scalar prefetch (SMEM), unused in body
                        x_ref, w1t_ref, b1_ref, w2t_ref, b2_ref, gate_ref,
                        out_ref, acc_ref):
    """One (row-tile, I-tile) step of gate * (silu(x @ w1^T + b1) @ w2^T + b2)."""
    li = pl.program_id(1)

    @pl.when(li == 0)
    def _():
        acc_ref[...] = jnp.zeros_like(acc_ref)

    x = x_ref[...]                                                    # (tm, H)
    h = jnp.dot(x, w1t_ref[...], preferred_element_type=jnp.float32)  # (tm, tI) f32
    h = h + b1_ref[...]
    h = (h * jax.nn.sigmoid(h)).astype(x.dtype)                       # silu, back to MXU dtype
    acc_ref[...] += jnp.dot(h, w2t_ref[...],
                            preferred_element_type=jnp.float32)       # (tm, H) f32

    @pl.when(li == pl.num_programs(1) - 1)
    def _():
        out_ref[...] = (gate_ref[...] * (acc_ref[...] + b2_ref[...])
                        ).astype(out_ref.dtype)


def _grouped_mlp_call(x, w1t, b1, w2t, b2, gates, tile_expert, *,
                      tm, ti, out_dtype, vmem_limit_bytes):
    """Padded grouped-GEMM MLP.

    x           : (P, H)   rows grouped by expert (tile_m-aligned groups, padding rows zero)
    w1t         : (E, H, I), b1: (E, 1, I), w2t: (E, I, H), b2: (E, 1, H)
    gates       : (P, 1) f32 per-row scale (0 on padding rows)
    tile_expert : (P//tm,) int32 expert id of each row tile (scalar-prefetched)
    """
    P, H = x.shape
    E, _, I = w1t.shape
    n_t = P // tm
    n_i = I // ti

    grid_spec = pltpu.PrefetchScalarGridSpec(
        num_scalar_prefetch=1,
        grid=(n_t, n_i),
        in_specs=[
            # x / gates / out: constant block index across li -> fetched/written once per tile.
            pl.BlockSpec((tm, H), lambda t, li, te: (t, 0)),
            # expert weights streamed one (H, tI)/(tI, H) tile at a time, expert chosen
            # by the scalar-prefetched tile->expert map (only active experts visited).
            pl.BlockSpec((None, H, ti), lambda t, li, te: (te[t], 0, li)),
            pl.BlockSpec((None, 1, ti), lambda t, li, te: (te[t], 0, li)),
            pl.BlockSpec((None, ti, H), lambda t, li, te: (te[t], li, 0)),
            pl.BlockSpec((None, 1, H), lambda t, li, te: (te[t], 0, 0)),
            pl.BlockSpec((tm, 1), lambda t, li, te: (t, 0)),
        ],
        out_specs=pl.BlockSpec((tm, H), lambda t, li, te: (t, 0)),
        scratch_shapes=[pltpu.VMEM((tm, H), jnp.float32)],
    )

    flops = 4 * P * H * I + 2 * P * H
    bytes_accessed = (P * H * x.dtype.itemsize                 # x in
                      + P * H * out_dtype.itemsize             # out
                      + n_t * 2 * H * I * w1t.dtype.itemsize   # streamed expert weights
                      + P * 4)                                  # gates
    cost = pl.CostEstimate(flops=int(flops), transcendentals=int(P * I),
                           bytes_accessed=int(bytes_accessed))

    return pl.pallas_call(
        _grouped_mlp_kernel,
        grid_spec=grid_spec,
        out_shape=jax.ShapeDtypeStruct((P, H), out_dtype),
        compiler_params=pltpu.CompilerParams(
            dimension_semantics=("parallel", "arbitrary"),
            vmem_limit_bytes=vmem_limit_bytes),
        cost_estimate=cost,
    )(tile_expert, x, w1t, b1, w2t, b2, gates)


# ------------------------------- wrapper --------------------------------------
def llama4_text_moe(hidden_states, params, *, top_k, num_experts,
                    tile_m=None, tile_i=None, vmem_limit_bytes=None,
                    compute_dtype=None):
    dflt = _device_defaults()
    tile_m = tile_m or dflt["tile_m"]
    tile_i = tile_i or dflt["tile_i"]
    vmem_limit_bytes = vmem_limit_bytes or dflt["vmem_limit_bytes"]

    B, L, H = hidden_states.shape
    N = B * L
    E = num_experts
    flat = hidden_states.reshape(N, H)
    in_dtype = flat.dtype
    cdt = jnp.dtype(compute_dtype) if compute_dtype is not None else in_dtype

    # ---------------- router: tiny GEMM + softmax + top-k (XLA) ----------------
    logits = jnp.dot(flat, params["router_w"].T,
                     preferred_element_type=jnp.float32)            # (N, E)
    gates = jax.nn.softmax(logits, axis=-1)                         # f32
    topk_vals, topk_idx = jax.lax.top_k(gates, top_k)               # (N, K)
    sparse_gates = jnp.zeros_like(gates).at[
        jnp.arange(N)[:, None], topk_idx].set(topk_vals).astype(in_dtype)
    # TODO(synk): load_balancing_loss is only stored as a module attribute in the
    # PyTorch module (never returned), so it is omitted here.

    I = params["shared_w1"].shape[0]
    ti = min(tile_i, I)
    if I % ti != 0:
        ti = I  # TODO(synk): pad I for non-divisible tile_i at exotic sizes.

    # ---------------- shared expert: same grouped-MLP Pallas kernel ------------
    tm_s = min(tile_m, _round_up(N, 8))
    Np = _round_up(N, tm_s)
    x_s = flat.astype(cdt)
    if Np != N:
        x_s = jnp.pad(x_s, ((0, Np - N), (0, 0)))
    shared_out = _grouped_mlp_call(
        x_s,
        params["shared_w1"].T[None].astype(cdt),                    # (1, H, I)
        params["shared_b1"].reshape(1, 1, -1).astype(jnp.float32),  # (1, 1, I)
        params["shared_w2"].T[None].astype(cdt),                    # (1, I, H)
        params["shared_b2"].reshape(1, 1, -1).astype(jnp.float32),  # (1, 1, H)
        jnp.ones((Np, 1), jnp.float32),
        jnp.zeros((Np // tm_s,), jnp.int32),
        tm=tm_s, ti=ti, out_dtype=in_dtype,
        vmem_limit_bytes=vmem_limit_bytes)[:N]

    # ---------------- routed experts: padded grouped GEMM ----------------------
    R = N * top_k
    tm = min(tile_m, _round_up(R, 8))

    expert_flat = topk_idx.reshape(R).astype(jnp.int32)
    token_flat = jnp.repeat(jnp.arange(N, dtype=jnp.int32), top_k)
    # torch casts sparse_gates to flat.dtype before using it as the scaling weight.
    gate_flat = topk_vals.reshape(R).astype(in_dtype).astype(jnp.float32)

    perm = jnp.argsort(expert_flat)                                 # stable
    e_sorted = expert_flat[perm]
    t_sorted = token_flat[perm]
    g_sorted = gate_flat[perm]

    group_sizes = jnp.bincount(expert_flat, length=E).astype(jnp.int32)
    padded_sizes = ((group_sizes + tm - 1) // tm) * tm
    zero = jnp.zeros((1,), jnp.int32)
    group_starts = jnp.concatenate([zero, jnp.cumsum(group_sizes)])[:E]
    pad_starts = jnp.concatenate([zero, jnp.cumsum(padded_sizes)])[:E]
    pad_ends = jnp.cumsum(padded_sizes)

    within = jnp.arange(R, dtype=jnp.int32) - group_starts[e_sorted]
    pos = pad_starts[e_sorted] + within                             # destination rows

    P = _round_up(R + E * (tm - 1), tm)                             # static row bound
    n_tiles = P // tm
    x_g = jnp.zeros((P, H), cdt).at[pos].set(flat[t_sorted].astype(cdt))
    g_g = jnp.zeros((P, 1), jnp.float32).at[pos].set(g_sorted[:, None])
    tok_g = jnp.zeros((P,), jnp.int32).at[pos].set(t_sorted)        # padding -> token 0, gate 0

    tile_expert = jnp.minimum(
        jnp.searchsorted(pad_ends, jnp.arange(n_tiles, dtype=jnp.int32) * tm,
                         side="right"),
        E - 1).astype(jnp.int32)

    ew1t = jnp.transpose(params["expert_w1"], (0, 2, 1)).astype(cdt)   # (E, H, I)
    ew2t = jnp.transpose(params["expert_w2"], (0, 2, 1)).astype(cdt)   # (E, I, H)
    eb1 = params["expert_b1"][:, None, :].astype(jnp.float32)          # (E, 1, I)
    eb2 = params["expert_b2"][:, None, :].astype(jnp.float32)          # (E, 1, H)

    routed = _grouped_mlp_call(x_g, ew1t, eb1, ew2t, eb2, g_g, tile_expert,
                               tm=tm, ti=ti, out_dtype=in_dtype,
                               vmem_limit_bytes=vmem_limit_bytes)       # (P, H)

    # scatter-add routed contributions back in token order (padding rows add 0).
    out = shared_out.at[tok_g].add(routed)
    return out.reshape(B, L, H), sparse_gates.reshape(B, L, E)


# ------------------------------ reference (plain JAX) -------------------------
def _mlp_ref(x, w1, b1, w2, b2):
    return jax.nn.silu(x @ w1.T + b1) @ w2.T + b2


def llama4_text_moe_ref(hidden_states, params, *, top_k, num_experts):
    B, L, H = hidden_states.shape
    N = B * L
    flat = hidden_states.reshape(N, H)
    logits = flat @ params["router_w"].T
    gates = jax.nn.softmax(logits, axis=-1)
    vals, inds = jax.lax.top_k(gates, top_k)
    sparse = jnp.zeros_like(gates).at[jnp.arange(N)[:, None], inds].set(vals)
    out = _mlp_ref(flat, params["shared_w1"], params["shared_b1"],
                   params["shared_w2"], params["shared_b2"])
    for e in range(num_experts):
        oe = _mlp_ref(flat, params["expert_w1"][e], params["expert_b1"][e],
                      params["expert_w2"][e], params["expert_b2"][e])
        out = out + sparse[:, e:e + 1] * oe
    return out.reshape(B, L, H), sparse.reshape(B, L, num_experts)


if __name__ == "__main__":
    # Small config consistent with Llama4TextConfig fields.
    H = 32          # hidden_size
    I = 64          # intermediate_size
    E = 8           # num_local_experts
    TOP_K = 2       # num_experts_per_tok
    B, L = 2, 8
    std = 0.02

    key = jax.random.PRNGKey(0)
    ks = jax.random.split(key, 12)
    params = {
        "router_w":  std * jax.random.normal(ks[0], (E, H), jnp.float32),
        "shared_w1": std * jax.random.normal(ks[1], (I, H), jnp.float32),
        "shared_b1": std * jax.random.normal(ks[2], (I,), jnp.float32),
        "shared_w2": std * jax.random.normal(ks[3], (H, I), jnp.float32),
        "shared_b2": std * jax.random.normal(ks[4], (H,), jnp.float32),
        "expert_w1": std * jax.random.normal(ks[5], (E, I, H), jnp.float32),
        "expert_b1": std * jax.random.normal(ks[6], (E, I), jnp.float32),
        "expert_w2": std * jax.random.normal(ks[7], (E, H, I), jnp.float32),
        "expert_b2": std * jax.random.normal(ks[8], (E, H), jnp.float32),
    }
    hidden_states = jax.random.normal(ks[9], (B, L, H), jnp.float32)

    out, sparse_gates = llama4_text_moe(hidden_states, params,
                                        top_k=TOP_K, num_experts=E)
    jax.block_until_ready((out, sparse_gates))

    out_ref, sparse_ref = llama4_text_moe_ref(hidden_states, params,
                                              top_k=TOP_K, num_experts=E)
    assert out.shape == (B, L, H) and sparse_gates.shape == (B, L, E)
    assert jnp.allclose(out, out_ref, atol=1e-3, rtol=1e-3)
    assert jnp.allclose(sparse_gates, sparse_ref, atol=1e-5, rtol=1e-5)

    print("KERNEL_OK")
</pallas_src>

<mosaic_0001>
module attributes {stable_mosaic.version = 11 : i64} {
  func.func @_grouped_mlp_kernel(%arg0: i32, %arg1: i32, %arg2: memref<1xi32, #tpu.memory_space<smem>>, %arg3: memref<16x32xf32, #tpu.memory_space<vmem>>, %arg4: memref<1x32x64xf32, #tpu.memory_space<vmem>>, %arg5: memref<1x1x64xf32, #tpu.memory_space<vmem>>, %arg6: memref<1x64x32xf32, #tpu.memory_space<vmem>>, %arg7: memref<1x1x32xf32, #tpu.memory_space<vmem>>, %arg8: memref<16x1xf32, #tpu.memory_space<vmem>>, %arg9: memref<16x32xf32, #tpu.memory_space<vmem>>, %arg10: memref<16x32xf32, #tpu.memory_space<vmem>>) attributes {dimension_semantics = [#tpu.dimension_semantics<parallel>, #tpu.dimension_semantics<arbitrary>], iteration_bounds = array<i64: 1, 1>, scalar_prefetch = 1 : i64, scratch_operands = 1 : i64, tpu.core_type = #tpu.core_type<tc>, window_params = [{transform_indices = @transform_0, window_bounds = array<i64: 16, 32>}, {transform_indices = @transform_1, window_bounds = array<i64: 1, 32, 64>}, {transform_indices = @transform_2, window_bounds = array<i64: 1, 1, 64>}, {transform_indices = @transform_3, window_bounds = array<i64: 1, 64, 32>}, {transform_indices = @transform_4, window_bounds = array<i64: 1, 1, 32>}, {transform_indices = @transform_5, window_bounds = array<i64: 16, 1>}, {transform_indices = @transform_6, window_bounds = array<i64: 16, 32>}]} {
    %c0_i32 = arith.constant 0 : i32
    %0 = arith.cmpi eq, %arg1, %c0_i32 : i32
    %1 = arith.extui %0 : i1 to i32
    %c0_i32_0 = arith.constant 0 : i32
    %2 = arith.cmpi ne, %1, %c0_i32_0 : i32
    scf.if %2 {
      %cst_19 = arith.constant 0.000000e+00 : f32
      %26 = vector.broadcast %cst_19 : f32 to vector<16x32xf32>
      %c0_20 = arith.constant 0 : index
      %c0_21 = arith.constant 0 : index
      %27 = vector.load %arg10[%c0_20, %c0_21] : memref<16x32xf32, #tpu.memory_space<vmem>>, vector<16x32xf32>
      tpu.vector_store %arg10[%c0_20, %c0_21], %26 {strides = array<i32>} : memref<16x32xf32, #tpu.memory_space<vmem>>, vector<16x32xf32>,
    } else {
    }
    %c0 = arith.constant 0 : index
    %c0_1 = arith.constant 0 : index
    %3 = vector.load %arg3[%c0, %c0_1] : memref<16x32xf32, #tpu.memory_space<vmem>>, vector<16x32xf32>
    %c0_2 = arith.constant 0 : index
    %c0_3 = arith.constant 0 : index
    %c0_4 = arith.constant 0 : index
    %4 = vector.load %arg4[%c0_2, %c0_3, %c0_4] : memref<1x32x64xf32, #tpu.memory_space<vmem>>, vector<1x32x64xf32>
    %5 = vector.shape_cast %4 : vector<1x32x64xf32> to vector<32x64xf32>
    %cst = arith.constant dense<0.000000e+00> : vector<16x64xf32>
    %6 = tpu.matmul %3, %5, %cst {dimension_numbers = #tpu.dot_dimension_numbers<[1], [0], [0], [1], [0, 0, 1, 1], [], []>} : vector<16x32xf32>, vector<32x64xf32>, vector<16x64xf32> -> vector<16x64xf32>
    %c0_5 = arith.constant 0 : index
    %c0_6 = arith.constant 0 : index
    %c0_7 = arith.constant 0 : index
    %7 = vector.load %arg5[%c0_5, %c0_6, %c0_7] : memref<1x1x64xf32, #tpu.memory_space<vmem>>, vector<1x1x64xf32>
    %8 = vector.shape_cast %7 : vector<1x1x64xf32> to vector<1x64xf32>
    %9 = vector.broadcast %8 : vector<1x64xf32> to vector<16x64xf32>
    %10 = arith.addf %6, %9 : vector<16x64xf32>
    %11 = arith.negf %10 : vector<16x64xf32>
    %12 = math.exp %11 : vector<16x64xf32>
    %cst_8 = arith.constant 1.000000e+00 : f32
    %13 = vector.broadcast %cst_8 : f32 to vector<16x64xf32>
    %14 = arith.addf %13, %12 : vector<16x64xf32>
    %15 = arith.divf %13, %14 : vector<16x64xf32>
    %16 = arith.mulf %10, %15 : vector<16x64xf32>
    %c0_9 = arith.constant 0 : index
    %c0_10 = arith.constant 0 : index
    %17 = vector.load %arg10[%c0_9, %c0_10] : memref<16x32xf32, #tpu.memory_space<vmem>>, vector<16x32xf32>
    %c0_11 = arith.constant 0 : index
    %c0_12 = arith.constant 0 : index
    %c0_13 = arith.constant 0 : index
    %18 = vector.load %arg6[%c0_11, %c0_12, %c0_13] : memref<1x64x32xf32, #tpu.memory_space<vmem>>, vector<1x64x32xf32>
    %19 = vector.shape_cast %18 : vector<1x64x32xf32> to vector<64x32xf32>
    %cst_14 = arith.constant dense<0.000000e+00> : vector<16x32xf32>
    %20 = tpu.matmul %16, %19, %cst_14 {dimension_numbers = #tpu.dot_dimension_numbers<[1], [0], [0], [1], [0, 0, 1, 1], [], []>} : vector<16x64xf32>, vector<64x32xf32>, vector<16x32xf32> -> vector<16x32xf32>
    %21 = arith.addf %17, %20 : vector<16x32xf32>
    %c0_15 = arith.constant 0 : index
    %c0_16 = arith.constant 0 : index
    %22 = vector.load %arg10[%c0_15, %c0_16] : memref<16x32xf32, #tpu.memory_space<vmem>>, vector<16x32xf32>
    tpu.vector_store %arg10[%c0_15, %c0_16], %21 {strides = array<i32>} : memref<16x32xf32, #tpu.memory_space<vmem>>, vector<16x32xf32>,
    %c0_i32_17 = arith.constant 0 : i32
    %23 = arith.cmpi eq, %arg1, %c0_i32_17 : i32
    %24 = arith.extui %23 : i1 to i32
    %c0_i32_18 = arith.constant 0 : i32
    %25 = arith.cmpi ne, %24, %c0_i32_18 : i32
    scf.if %25 {
      %c0_19 = arith.constant 0 : index
      %c0_20 = arith.constant 0 : index
      %26 = vector.load %arg8[%c0_19, %c0_20] : memref<16x1xf32, #tpu.memory_space<vmem>>, vector<16x1xf32>
      %c0_21 = arith.constant 0 : index
      %c0_22 = arith.constant 0 : index
      %27 = vector.load %arg10[%c0_21, %c0_22] : memref<16x32xf32, #tpu.memory_space<vmem>>, vector<16x32xf32>
      %c0_23 = arith.constant 0 : index
      %c0_24 = arith.constant 0 : index
      %c0_25 = arith.constant 0 : index
      %28 = vector.load %arg7[%c0_23, %c0_24, %c0_25] : memref<1x1x32xf32, #tpu.memory_space<vmem>>, vector<1x1x32xf32>
      %29 = vector.shape_cast %28 : vector<1x1x32xf32> to vector<1x32xf32>
      %30 = vector.broadcast %29 : vector<1x32xf32> to vector<16x32xf32>
      %31 = arith.addf %27, %30 : vector<16x32xf32>
      %32 = vector.broadcast %26 : vector<16x1xf32> to vector<16x32xf32>
      %33 = arith.mulf %32, %31 : vector<16x32xf32>
      %c0_26 = arith.constant 0 : index
      %c0_27 = arith.constant 0 : index
      %34 = vector.load %arg9[%c0_26, %c0_27] : memref<16x32xf32, #tpu.memory_space<vmem>>, vector<16x32xf32>
      tpu.vector_store %arg9[%c0_26, %c0_27], %33 {strides = array<i32>} : memref<16x32xf32, #tpu.memory_space<vmem>>, vector<16x32xf32>,
    } else {
    }
    return
  }
  func.func @transform_0(%arg0: i32, %arg1: i32, %arg2: memref<1xi32, #tpu.memory_space<smem>>) -> (i32, i32) {
    %c0_i32 = arith.constant 0 : i32
    %c0_i32_0 = arith.constant 0 : i32
    return %arg0, %c0_i32 : i32, i32
  }
  func.func @transform_1(%arg0: i32, %arg1: i32, %arg2: memref<1xi32, #tpu.memory_space<smem>>) -> (i32, i32, i32) {
    %0 = arith.index_cast %arg0 : i32 to index
    %1 = memref.load %arg2[%0] : memref<1xi32, #tpu.memory_space<smem>>
    %c0_i32 = arith.constant 0 : i32
    %c0_i32_0 = arith.constant 0 : i32
    return %1, %c0_i32, %arg1 : i32, i32, i32
  }
  func.func @transform_2(%arg0: i32, %arg1: i32, %arg2: memref<1xi32, #tpu.memory_space<smem>>) -> (i32, i32, i32) {
    %0 = arith.index_cast %arg0 : i32 to index
    %1 = memref.load %arg2[%0] : memref<1xi32, #tpu.memory_space<smem>>
    %c0_i32 = arith.constant 0 : i32
    %c0_i32_0 = arith.constant 0 : i32
    return %1, %c0_i32, %arg1 : i32, i32, i32
  }
  func.func @transform_3(%arg0: i32, %arg1: i32, %arg2: memref<1xi32, #tpu.memory_space<smem>>) -> (i32, i32, i32) {
    %0 = arith.index_cast %arg0 : i32 to index
    %1 = memref.load %arg2[%0] : memref<1xi32, #tpu.memory_space<smem>>
    %c0_i32 = arith.constant 0 : i32
    %c0_i32_0 = arith.constant 0 : i32
    return %1, %arg1, %c0_i32 : i32, i32, i32
  }
  func.func @transform_4(%arg0: i32, %arg1: i32, %arg2: memref<1xi32, #tpu.memory_space<smem>>) -> (i32, i32, i32) {
    %0 = arith.index_cast %arg0 : i32 to index
    %1 = memref.load %arg2[%0] : memref<1xi32, #tpu.memory_space<smem>>
    %c0_i32 = arith.constant 0 : i32
    %c0_i32_0 = arith.constant 0 : i32
    %c0_i32_1 = arith.constant 0 : i32
    return %1, %c0_i32, %c0_i32_0 : i32, i32, i32
  }
  func.func @transform_5(%arg0: i32, %arg1: i32, %arg2: memref<1xi32, #tpu.memory_space<smem>>) -> (i32, i32) {
    %c0_i32 = arith.constant 0 : i32
    %c0_i32_0 = arith.constant 0 : i32
    return %arg0, %c0_i32 : i32, i32
  }
  func.func @transform_6(%arg0: i32, %arg1: i32, %arg2: memref<1xi32, #tpu.memory_space<smem>>) -> (i32, i32) {
    %c0_i32 = arith.constant 0 : i32
    %c0_i32_0 = arith.constant 0 : i32
    return %arg0, %c0_i32 : i32, i32
  }
}

</mosaic_0001>

<bundles_post_ra>
// kernel: tpu_custom_call.1
= control target key start
LH: loop header
LB: loop body
LE: loop exit
PB: predicated region body
PF: predicated region fallthrough
CT: control target
= control target key end

     0   :  { %vm98_vm0 = vcmask 261120   ;;  %s558_s0 = inlined_call_operand.<no memory space> [shape: s32[1], index: 0, kind: input, shape index: {}]   ;;  %s559_s1 = inlined_call_operand.vmem [shape: f32[16,32], index: 1, kind: input, shape index: {}]   ;;  %s560_s2 = inlined_call_operand.vmem [shape: f32[1,32,64], index: 2, kind: input, shape index: {}]   ;;  %s561_s3 = inlined_call_operand.vmem [shape: f32[1,1,64], index: 3, kind: input, shape index: {}]   ;;  %s562_s4 = inlined_call_operand.vmem [shape: f32[1,64,32], index: 4, kind: input, shape index: {}]   ;;  %s563_s5 = inlined_call_operand.vmem [shape: f32[1,1,32], index: 5, kind: input, shape index: {}]   ;;  %s564_s6 = inlined_call_operand.vmem [shape: f32[16,1], index: 6, kind: input, shape index: {}]   ;;  %s565_s7 = inlined_call_operand.hbm [shape: f32[16,32], index: 7, kind: output, shape index: {}]  }
   0x1   :  { %p71_p0 = scmp.lt.s32.totalorder %s558_s0, 0  ;;  %v101_v0 = vld [vmem:[%s559_s1] sm:$0xff] }
   0x2   :  { %13 = vsyncpa [#allocation6], 0  ;;  %408 = vmatprep.mubr.msk.f32.mxu0 %vm98_vm0, %v101_v0  ;;  %v102_v5 = vld [vmem:[%s559_s1 + $0x8] sm:$0xff]  ;;  %v309_v14 = vld [vmem:[%s564_s6] sm:$0xff]  ;;  %v466_v15 = vmov 0   ;;  %v467_v16 = vmov 0.0  }
   0x3   :  { %s567_s0 = smov (!%p71_p0, %s558_s0), 0  ;;  %435 = vset.pattern.permute.xlu0 %v466_v15  ;;  %100 = vst.msk [vmem:[#allocation2 + $0x8] sm:$0xff] %vm98_vm0, %v467_v16  ;;  %99 = vst.msk [vmem:[#allocation2] sm:$0xff] %vm98_vm0, %v467_v16  ;;  %v310_v17 = vld [vmem:[%s564_s6 + $0x8] sm:$0xff]  ;;  %vm220_vm1 = vcmask 523264   ;;  %s468_s22 = smov [#allocation5]  }
   0x4   :  { %s382_s30 = sshll.u32 %s567_s0, 5  ;;  %s383_s13 = sshll.u32 %s567_s0, 6  ;;  %324 = vperm.xlu0 %435, %v309_v14  }
   0x5   :  { %s75_s10 = scalar_lea.vmem %s560_s2, %s382_s30  ;;  %s87_s15 = scalar_lea.vmem %s562_s4, %s383_s13 }
   0x6   :  { %v106_v1 = vld [vmem:[%s75_s10 + $0x18] sm:$0xff]  ;;  %v105_v2 = vld [vmem:[%s75_s10 + $0x10] sm:$0xff]  ;;  %v104_v3 = vld [vmem:[%s75_s10 + $0x8] sm:$0xff]  ;;  %s80_s20 = scalar_lea.vmem %s561_s3, %s567_s0  ;;  %s92_s21 = scalar_lea.vmem %s563_s5, %s567_s0 }
   0x7   :  { %400 = vmatprep.subr.mxu0 %v106_v1  ;;  %v103_v4 = vld [vmem:[%s75_s10] sm:$0xff]  ;;  %v219_v6 = vld [vmem:[%s87_s15 + $0x38] sm:$0xff]  ;;  %v218_v7 = vld [vmem:[%s87_s15 + $0x30] sm:$0xff]  ;;  %s341_s23 = sshll.u32 %s468_s22, 4  ;;  %s342_s23 = int_to_ptr.vmem [resolvable:$true] %s341_s23 }
   0x8   :  { %401 = vmatpush3.msra.mxu0 %v106_v1  ;;  %411 = vmatprep.subr.mxu1 %v219_v6  ;;  %v217_v8 = vld [vmem:[%s87_s15 + $0x28] sm:$0xff]  ;;  %v216_v9 = vld [vmem:[%s87_s15 + $0x20] sm:$0xff]  ;;  %v215_v10 = vld [vmem:[%s87_s15 + $0x18] sm:$0xff]  ;;  %s444_s24 = scalar_lea.vmem %s342_s23, 256  ;;  %p449_p2 = scmp.lt.s32.totalorder %s342_s23, %s342_s23 }
   0x9   :  { %402 = vmatprep.subr.mxu0 %v105_v2  ;;  %412 = vmatpush3.msra.mxu1 %v219_v6  ;;  %v214_v11 = vld [vmem:[%s87_s15 + $0x10] sm:$0xff]  ;;  %v213_v12 = vld [vmem:[%s87_s15 + $0x8] sm:$0xff]  ;;  %v212_v13 = vld [vmem:[%s87_s15] sm:$0xff]  ;;  %p445_p1 = scmp.ne.s32.totalorder %s342_s23, %s444_s24  ;;  %p450_p3 = scmp.lt.s32.totalorder %s444_s24, %s444_s24 }
   0xa   :  { %403 = vmatpush3.msra.mxu0 %v105_v2  ;;  %413 = vmatprep.subr.mxu1 %v218_v7  ;;  %v374_v18 = vld [vmem:[%s80_s20] ss:$0 sm:$0xff]  ;;  %v211_v33 = vld [vmem:[#allocation2 + $0x8] sm:$0xff] }
   0xb   :  { %404 = vmatprep.subr.mxu0 %v104_v3  ;;  %414 = vmatpush3.msra.mxu1 %v218_v7  ;;  %v210_v35 = vld [vmem:[#allocation2] sm:$0xff]  ;;  %p451_p4 = por %p450_p3, %p449_p2 }
   0xc   :  { %405 = vmatpush3.msra.mxu0 %v104_v3  ;;  %415 = vmatprep.subr.mxu1 %v217_v8  ;;  %v381_v40 = vld [vmem:[%s92_s21] ss:$0 sm:$0xff] }
   0xd   :  { %406 = vmatprep.subr.mxu0 %v103_v4  ;;  %416 = vmatpush3.msra.mxu1 %v217_v8  ;;  %p452_p5 = pnand %p451_p4, %p445_p1 }
   0xe   :  { %407 = vmatpush3.msra.mxu0 %v103_v4  ;;  %417 = vmatprep.subr.mxu1 %v216_v9 }
   0xf   :  { %409 = vmatmul.mubr.msk.f32.vlgmr.msra.gmra.mxu0 %vm98_vm0, %v102_v5  ;;  %418 = vmatpush3.msra.mxu1 %v216_v9 }
  0x10   :  { %419 = vmatprep.subr.mxu1 %v215_v10  ;;  %329 = vperm.xlu0 %435, %v310_v17  }
  0x11   :  { %420 = vmatpush3.msra.mxu1 %v215_v10 }
  0x12   :  { %421 = vmatprep.subr.mxu1 %v214_v11 }
  0x13   :  { %422 = vmatpush3.msra.mxu1 %v214_v11 }
  0x14   :  { %423 = vmatprep.subr.mxu1 %v213_v12 }
  0x15   :  { %424 = vmatpush3.msra.mxu1 %v213_v12 }
  0x16   :  { %425 = vmatprep.subr.mxu1 %v212_v13 }
  0x17   :  { %426 = vmatpush3.msra.mxu1 %v212_v13 }
  0x7f   :  { %v325_v39 = vpop.permute.xlu0 %324 }
  0x8b   :  { %v330_v44 = vpop.permute.xlu0 %329 }
  0xcf   :  { %v410_v19 = vpop.f32.mrf.mxu0 }
  0xd0   :  { %v193_v20 = vadd.f32 %v410_v19, %v374_v18 }
  0xd1   :  { %v187_v21 = vpop.f32.mrf.mxu0 }
  0xd2   :  { %v378_v22 = vmul.f32 -1.442695, %v193_v20  ;;  %v188_v23 = vadd.f32 %v374_v18, %v187_v21 }
  0xd4   :  { %436 = vpow2.f32 %v378_v22  ;;  %v377_v24 = vmul.f32 -1.442695, %v188_v23 }
  0xd6   :  { %438 = vpow2.f32 %v377_v24 }
  0xe1   :  { %v437_v25 = vpop.eup %436 }
  0xe2   :  { %v203_v26 = vadd.f32 1.0, %v437_v25 }
  0xe3   :  { %v439_v27 = vpop.eup %438 }
  0xe4   :  { %v202_v28 = vadd.f32 1.0, %v439_v27  ;;  %440 = vrcp.f32 %v203_v26 }
  0xe6   :  { %442 = vrcp.f32 %v202_v28 }
  0xf1   :  { %v441_v29 = vpop.eup %440 }
  0xf2   :  { %v209_v32 = vmul.f32 %v441_v29, %v193_v20 }
  0xf3   :  { %v443_v30 = vpop.eup %442 }
  0xf4   :  { %v208_v31 = vmul.f32 %v443_v30, %v188_v23 }
  0xf6   :  { %427 = vmatprep.mubr.msk.f32.mxu1 %vm220_vm1, %v208_v31 }
  0xf7   :  { %428 = vmatmul.mubr.msk.f32.vlgmr.msra.gmra.mxu1 %vm220_vm1, %v209_v32 }
 0x1b7   :  { %v429_v34 = vpop.f32.mrf.mxu1 }
 0x1b8   :  { %v303_v36 = vadd.f32 %v429_v34, %v211_v33 }
 0x1b9   :  { %v293_v37 = vpop.f32.mrf.mxu1 }
 0x1ba   :  { %305 = vst.msk [vmem:[#allocation2 + $0x8] sm:$0xff] %vm98_vm0, %v303_v36  ;;  %v302_v38 = vadd.f32 %v293_v37, %v210_v35 }
 0x1bc   :  { %304 = vst.msk [vmem:[#allocation2] sm:$0xff] %vm98_vm0, %v302_v38 }
 0x1c1   :  { %v312_v41 = vld [vmem:[#allocation2 + $0x8] sm:$0xff] }
 0x1c2   :  { %v321_v42 = vadd.f32 %v381_v40, %v312_v41 }
 0x1c3   :  { %v311_v43 = vld [vmem:[#allocation2] sm:$0xff] }
 0x1c4   :  { %v320_v45 = vadd.f32 %v381_v40, %v311_v43  ;;  %v333_v46 = vmul.f32 %v330_v44, %v321_v42 }
 0x1c6   :  { %v332_v47 = vmul.f32 %v325_v39, %v320_v45  ;;  %335 = vst.msk [vmem:[#allocation5 + $0x8] sm:$0xff] %vm98_vm0, %v333_v46 }
 0x1c8   :  { %334 = vst.msk [vmem:[#allocation5] sm:$0xff] %vm98_vm0, %v332_v47 }
 0x1c9   :  { %455 = shalt.err (!%p452_p5)
}
 0x1ca   :  { %s469_s0 = smov 128   ;;  %s470_s5 = smov 8  }
 0x1cb   :  { %347 = dma.vmem_to_hbm [thread:$0]  %s342_s23, 256, %s565_s7, [#allocation6], %s469_s0, %s469_s0, %s470_s5  }
 0x1cc   :  { %464 = dma.done.wait [#allocation6], 256  }
 0x1cd   :  { %465 = vsyncadd [#allocation6], 4294967040 }
 0x1ce   :  { %351 = vsyncpa [#allocation6], 1 }

</bundles_post_ra>
